<compile_context>
chip_gen: v5e
topology: v5e:2x2
jax: 0.10.0
libtpu: 0.0.40
codegen_flags: <defaults>
</compile_context>

<pallas_src>
import functools
import math

import jax
import jax.numpy as jnp
from jax import lax
from jax.experimental import pallas as pl
from jax.experimental.pallas import tpu as pltpu


def _round_up(x, m):
    return ((x + m - 1) // m) * m


# ---------------------------------------------------------------------------
# Fast path: whole table resident in VMEM; gather via one-hot matmul (MXU).
# ---------------------------------------------------------------------------
def _embedding_vmem_kernel(ids_ref, table_ref, out_ref, *, scale, vocab_size):
    # ids_ref:   (TM, 1) int32 block of token ids
    # table_ref: (V, D) full embedding table (resident in VMEM)
    # out_ref:   (TM, D) output block (sublane/lane dense)
    ids = ids_ref[...]                                          # (TM, 1)
    tm = ids.shape[0]
    col = lax.broadcasted_iota(jnp.int32, (tm, vocab_size), 1)  # (TM, V)
    one_hot = (ids == col).astype(table_ref.dtype)              # exact 0/1
    gathered = jnp.dot(
        one_hot,
        table_ref[...],
        preferred_element_type=jnp.float32,
        precision=jax.lax.Precision.HIGHEST,
    )                                                           # (TM, D)
    out_ref[...] = (gathered * scale).astype(out_ref.dtype)


# ---------------------------------------------------------------------------
# General path: table in HBM; TM row DMAs per grid step, `inflight` in flight.
# ---------------------------------------------------------------------------
def _embedding_hbm_kernel(idx_ref, table_hbm, out_ref, slab, sems, *,
                          scale, tm, inflight):
    # idx_ref:   scalar-prefetched (N_pad,) int32 ids in SMEM
    # table_hbm: (V, D) table left in HBM (memory_space=pl.ANY)
    # out_ref:   (TM, D) output block
    # slab:      (TM, D) VMEM staging buffer
    # sems:      (inflight,) DMA semaphores
    base = pl.program_id(0) * tm

    def _copy(t):
        row = idx_ref[base + t]
        return pltpu.make_async_copy(
            table_hbm.at[pl.ds(row, 1)],
            slab.at[pl.ds(t, 1)],
            sems.at[t % inflight],
        )

    # Prime `inflight` row fetches (static unroll).
    for t in range(inflight):
        _copy(t).start()

    @pl.loop(0, tm)
    def _(t):
        _copy(t).wait()

        @pl.when(t + inflight < tm)
        def _():
            _copy(t + inflight).start()

    # One vectorized scale + dense (TM, D) store.
    out_ref[...] = (slab[...] * scale).astype(out_ref.dtype)


# ---------------------------------------------------------------------------
# Wrapper
# ---------------------------------------------------------------------------
def embedding_forward(ids, table, *, num_units=None, scale=True,
                      tm=256, inflight=8, force_hbm_gather=False,
                      vmem_table_bytes_limit=8 * 1024 * 1024):
    """ids: int (...,) tensor; table: (V, D) float32 -> (..., D) float32."""
    orig_shape = tuple(ids.shape)
    V, D = table.shape
    if num_units is None:
        num_units = D
    scale_val = float(num_units) ** 0.5 if scale else 1.0

    N = 1
    for s in orig_shape:
        N *= int(s)

    # Clamp ids: an out-of-range id would otherwise drive an OOB HBM DMA.
    flat_ids = jnp.clip(ids.reshape(N).astype(jnp.int32), 0, V - 1)

    # Token tile: multiple of 8 sublanes, no larger than the (padded) problem.
    tm = max(8, min(int(tm), _round_up(N, 8)))
    tm = _round_up(tm, 8)
    n_pad = _round_up(N, tm)
    if n_pad != N:
        flat_ids = jnp.pad(flat_ids, (0, n_pad - N))   # pad with id 0 (valid)
    num_tiles = n_pad // tm

    table_bytes = V * D * table.dtype.itemsize
    use_vmem_table = (not force_hbm_gather) and table_bytes <= vmem_table_bytes_limit

    compiler_params = pltpu.CompilerParams(
        dimension_semantics=("parallel",),           # no cross-step state
        vmem_limit_bytes=32 * 1024 * 1024,
    )

    if use_vmem_table:
        kernel = functools.partial(
            _embedding_vmem_kernel, scale=scale_val, vocab_size=V)
        out = pl.pallas_call(
            kernel,
            out_shape=jax.ShapeDtypeStruct((n_pad, D), table.dtype),
            grid_spec=pltpu.PrefetchScalarGridSpec(
                num_scalar_prefetch=0,
                grid=(num_tiles,),
                in_specs=[
                    pl.BlockSpec((tm, 1), lambda i: (i, 0)),   # ids tile
                    pl.BlockSpec((V, D), lambda i: (0, 0)),    # whole table
                ],
                out_specs=pl.BlockSpec((tm, D), lambda i: (i, 0)),
            ),
            compiler_params=compiler_params,
        )(flat_ids.reshape(n_pad, 1), table)
    else:
        inflight_eff = max(1, min(int(inflight), tm))
        kernel = functools.partial(
            _embedding_hbm_kernel, scale=scale_val, tm=tm, inflight=inflight_eff)
        out = pl.pallas_call(
            kernel,
            out_shape=jax.ShapeDtypeStruct((n_pad, D), table.dtype),
            grid_spec=pltpu.PrefetchScalarGridSpec(
                num_scalar_prefetch=1,                 # flat ids -> SMEM
                grid=(num_tiles,),
                in_specs=[pl.BlockSpec(memory_space=pl.ANY)],  # table in HBM
                out_specs=pl.BlockSpec((tm, D), lambda i, idx: (i, 0)),
                scratch_shapes=[
                    pltpu.VMEM((tm, D), table.dtype),
                    pltpu.SemaphoreType.DMA((inflight_eff,)),
                ],
            ),
            compiler_params=compiler_params,
        )(flat_ids, table)

    if n_pad != N:
        out = out[:N]
    return out.reshape(*orig_shape, D)


def init_embedding_table(key, vocab_size, num_units, zeros_pad=True):
    """Deterministic xavier-normal init; row 0 zeroed if zeros_pad."""
    std = math.sqrt(2.0 / (vocab_size + num_units))
    table = std * jax.random.normal(key, (vocab_size, num_units), dtype=jnp.float32)
    if zeros_pad:
        table = table.at[0, :].set(0.0)
    return table
    # TODO(synk): for bandwidth-bound deployments the table can be stored in
    # bfloat16 and upcast in-kernel; kept float32 here to match torch exactly.


if __name__ == "__main__":
    vocab_size = 64
    num_units = 128      # lane-dense last dim
    B, T = 2, 8

    key = jax.random.PRNGKey(0)
    k_table, k_ids = jax.random.split(key)

    table = init_embedding_table(k_table, vocab_size, num_units, zeros_pad=True)
    ids = jax.random.randint(k_ids, (B, T), minval=0, maxval=vocab_size,
                             dtype=jnp.int32)

    ref = jnp.take(table, ids, axis=0) * (num_units ** 0.5)

    # Fast path: VMEM-resident table, one-hot MXU gather, (TM, D) dense blocks.
    out_fast = embedding_forward(ids, table, num_units=num_units, scale=True)
    out_fast = jax.block_until_ready(out_fast)
    assert out_fast.shape == (B, T, num_units)
    assert jnp.allclose(out_fast, ref, rtol=1e-5, atol=1e-5), "fast path mismatch"

    # General path: HBM table + manual multi-in-flight row DMAs (exercised with
    # small tiles so multiple grid steps run).
    out_hbm = embedding_forward(ids, table, num_units=num_units, scale=True,
                                tm=8, inflight=4, force_hbm_gather=True)
    out_hbm = jax.block_until_ready(out_hbm)
    assert jnp.allclose(out_hbm, ref, rtol=1e-6, atol=1e-6), "HBM path mismatch"

    print("KERNEL_OK")
</pallas_src>

<mosaic_0001>
module attributes {stable_mosaic.version = 11 : i64} {
  func.func @_embedding_vmem_kernel(%arg0: i32, %arg1: memref<16x1xi32, #tpu.memory_space<vmem>>, %arg2: memref<64x128xf32, #tpu.memory_space<vmem>>, %arg3: memref<16x128xf32, #tpu.memory_space<vmem>>) attributes {dimension_semantics = [#tpu.dimension_semantics<parallel>], iteration_bounds = array<i64: 1>, scalar_prefetch = 0 : i64, scratch_operands = 0 : i64, tpu.core_type = #tpu.core_type<tc>, window_params = [{transform_indices = @transform_0, window_bounds = array<i64: 16, 1>}, {pipeline_mode = #tpu.pipeline_mode<synchronous>, transform_indices = @transform_1, window_bounds = array<i64: 64, 128>}, {transform_indices = @transform_2, window_bounds = array<i64: 16, 128>}]} {
    %c0 = arith.constant 0 : index
    %c0_0 = arith.constant 0 : index
    %0 = vector.load %arg1[%c0, %c0_0] : memref<16x1xi32, #tpu.memory_space<vmem>>, vector<16x1xi32>
    %1 = tpu.iota {dimensions = array<i32: 1>} : vector<16x64xi32>
    %2 = vector.broadcast %0 : vector<16x1xi32> to vector<16x64xi32>
    %3 = arith.cmpi eq, %2, %1 : vector<16x64xi32>
    %4 = arith.extui %3 : vector<16x64xi1> to vector<16x64xi32>
    %5 = arith.sitofp %4 : vector<16x64xi32> to vector<16x64xf32>
    %c0_1 = arith.constant 0 : index
    %c0_2 = arith.constant 0 : index
    %6 = vector.load %arg2[%c0_1, %c0_2] : memref<64x128xf32, #tpu.memory_space<vmem>>, vector<64x128xf32>
    %cst = arith.constant dense<0.000000e+00> : vector<16x128xf32>
    %7 = tpu.matmul %5, %6, %cst {dimension_numbers = #tpu.dot_dimension_numbers<[1], [0], [0], [1], [0, 0, 1, 1], [], []>, precision = #tpu.contract_precision<fp32>} : vector<16x64xf32>, vector<64x128xf32>, vector<16x128xf32> -> vector<16x128xf32>
    %cst_3 = arith.constant 11.3137083 : f32
    %8 = vector.broadcast %cst_3 : f32 to vector<16x128xf32>
    %9 = arith.mulf %7, %8 : vector<16x128xf32>
    %c0_4 = arith.constant 0 : index
    %c0_5 = arith.constant 0 : index
    %10 = vector.load %arg3[%c0_4, %c0_5] : memref<16x128xf32, #tpu.memory_space<vmem>>, vector<16x128xf32>
    tpu.vector_store %arg3[%c0_4, %c0_5], %9 {strides = array<i32>} : memref<16x128xf32, #tpu.memory_space<vmem>>, vector<16x128xf32>,
    return
  }
  func.func @transform_0(%arg0: i32) -> (i32, i32) {
    %c0_i32 = arith.constant 0 : i32
    %c0_i32_0 = arith.constant 0 : i32
    return %arg0, %c0_i32 : i32, i32
  }
  func.func @transform_1(%arg0: i32) -> (i32, i32) {
    %c0_i32 = arith.constant 0 : i32
    %c0_i32_0 = arith.constant 0 : i32
    %c0_i32_1 = arith.constant 0 : i32
    return %c0_i32, %c0_i32_0 : i32, i32
  }
  func.func @transform_2(%arg0: i32) -> (i32, i32) {
    %c0_i32 = arith.constant 0 : i32
    %c0_i32_0 = arith.constant 0 : i32
    return %arg0, %c0_i32 : i32, i32
  }
}

</mosaic_0001>

<bundles_post_ra>
// kernel: tpu_custom_call.1
= control target key start
LH: loop header
LB: loop body
LE: loop exit
PB: predicated region body
PF: predicated region fallthrough
CT: control target
= control target key end

     0   :  { %7 = vsyncpa [#allocation3], 0  ;;  %s539_s0 = inlined_call_operand.vmem [shape: s32[16,1], index: 0, kind: input, shape index: {}]   ;;  %s540_s1 = inlined_call_operand.hbm [shape: f32[64,128], index: 1, kind: input, shape index: {}]   ;;  %s541_s2 = inlined_call_operand.hbm [shape: f32[16,128], index: 2, kind: output, shape index: {}]  }
   0x1   :  { %8 = vsyncpa [#allocation4], 0  ;;  %s15_s11 = sshll.u32 %s540_s1, 4  ;;  %s433_s12 = smov [#allocation2]   ;;  %s16_s11 = int_to_ptr.hbm [resolvable:$true] %s15_s11 }
   0x2   :  { %s17_s13 = sshll.u32 %s433_s12, 4  ;;  %s434_s14 = smov 128   ;;  %s18_s13 = int_to_ptr.vmem [resolvable:$true] %s17_s13 }
   0x3   :  { %s435_s15 = smov 8  }
   0x4   :  { %23 = dma.hbm_to_vmem [thread:$0]  %s16_s11, 1024, %s18_s13, [#allocation3], %s434_s14, %s434_s14, %s435_s15  }
   0x5   :  { %429 = dma.done.wait [#allocation3], 1024  }
   0x6   :  { %430 = vsyncadd [#allocation3], 4294966272  ;;  %v436_v0 = vmov 0   ;;  %v28_v1 = vld [vmem:[%s539_s0] sm:$0xff]  ;;  %v51_v2 = vld [vmem:[#allocation2 + $0x38] sm:$0xff]  ;;  %v30_v51 = vlaneseq  ;;  %vm52_vm0 = vcmask 523264  }
   0x7   :  { %380 = vset.pattern.permute.xlu0 %v436_v0  ;;  %v463_v3 = vand.u32 4294901760, %v51_v2  ;;  %v50_v4 = vld [vmem:[#allocation2 + $0x30] sm:$0xff]  ;;  %v49_v5 = vld [vmem:[#allocation2 + $0x28] sm:$0xff]  ;;  %v48_v6 = vld [vmem:[#allocation2 + $0x20] sm:$0xff]  ;;  %v437_v54 = vmov 0.0   ;;  %s337_s22 = sshll.u32 %s541_s2, 4  ;;  %s338_s22 = int_to_ptr.hbm [resolvable:$true] %s337_s22 }
   0x8   :  { %33 = vperm.xlu0 %380, %v28_v1   ;;  %v465_v7 = vand.u32 4294901760, %v50_v4  ;;  %v467_v8 = vand.u32 4294901760, %v49_v5  ;;  %v469_v9 = vand.u32 4294901760, %v48_v6  ;;  %v47_v10 = vld [vmem:[#allocation2 + $0x18] sm:$0xff]  ;;  %v46_v11 = vld [vmem:[#allocation2 + $0x10] sm:$0xff]  ;;  %v45_v12 = vld [vmem:[#allocation2 + $0x8] sm:$0xff] }
   0x9   :  { %v109_v13 = vsub.f32 %v51_v2, %v463_v3  ;;  %217 = vmatpush.msra.mxu3 %v463_v3  ;;  %v473_v14 = vand.u32 4294901760, %v47_v10  ;;  %68 = vmatpush.msra.mxu0 %v463_v3  ;;  %v476_v15 = vand.u32 4294901760, %v46_v11  ;;  %v478_v16 = vand.u32 4294901760, %v45_v12  ;;  %v29_v23 = vld [vmem:[%s539_s0 + $0x8] sm:$0xff]  ;;  %v44_v45 = vld [vmem:[#allocation2] sm:$0xff]  ;;  %s438_s0 = smov [#allocation5]  }
   0xa   :  { %v115_v17 = vsub.f32 %v50_v4, %v465_v7  ;;  %v121_v18 = vsub.f32 %v49_v5, %v467_v8  ;;  %v127_v19 = vsub.f32 %v48_v6, %v469_v9  ;;  %v81_v46 = vand.u32 4294901760, %v44_v45  ;;  %s335_s19 = sshll.u32 %s438_s0, 4  ;;  %s336_s19 = int_to_ptr.vmem [resolvable:$true] %s335_s19 }
   0xb   :  { %v110_v20 = vand.u32 4294901760, %v109_v13  ;;  %175 = vmatpush.msra.mxu2 %v109_v13  ;;  %219 = vmatpush.msra.mxu3 %v465_v7  ;;  %v133_v21 = vsub.f32 %v47_v10, %v473_v14  ;;  %v139_v22 = vsub.f32 %v46_v11, %v476_v15  ;;  %v145_v29 = vsub.f32 %v45_v12, %v478_v16 }
   0xc   :  { %v116_v24 = vand.u32 4294901760, %v115_v17  ;;  %v122_v25 = vand.u32 4294901760, %v121_v18  ;;  %v489_v26 = vand.u32 4294901760, %v127_v19  ;;  %70 = vmatpush.msra.mxu0 %v465_v7  ;;  %v151_v47 = vsub.f32 %v44_v45, %v81_v46 }
   0xd   :  { %v111_v27 = vsub.f32 %v109_v13, %v110_v20  ;;  %178 = vmatpush.msra.mxu2 %v115_v17  ;;  %v492_v28 = vand.u32 4294901760, %v133_v21  ;;  %221 = vmatpush.msra.mxu3 %v467_v8  ;;  %v140_v34 = vand.u32 4294901760, %v139_v22  ;;  %v146_v38 = vand.u32 4294901760, %v145_v29 }
   0xe   :  { %v117_v30 = vsub.f32 %v115_v17, %v116_v24  ;;  %v123_v31 = vsub.f32 %v121_v18, %v122_v25  ;;  %72 = vmatpush.msra.mxu0 %v467_v8  ;;  %v129_v33 = vsub.f32 %v127_v19, %v489_v26  ;;  %v152_v48 = vand.u32 4294901760, %v151_v47 }
   0xf   :  { %v112_v32 = vand.u32 4294901760, %v111_v27  ;;  %181 = vmatpush.msra.mxu2 %v121_v18  ;;  %223 = vmatpush.msra.mxu3 %v469_v9  ;;  %v135_v37 = vsub.f32 %v133_v21, %v492_v28  ;;  %v141_v40 = vsub.f32 %v139_v22, %v140_v34  ;;  %v147_v42 = vsub.f32 %v145_v29, %v146_v38 }
  0x10   :  { %36 = vperm.xlu0 %380, %v29_v23   ;;  %v118_v35 = vand.u32 4294901760, %v117_v30  ;;  %74 = vmatpush.msra.mxu0 %v469_v9  ;;  %v124_v36 = vand.u32 4294901760, %v123_v31  ;;  %v130_v39 = vand.u32 4294901760, %v129_v33  ;;  %v153_v49 = vsub.f32 %v151_v47, %v152_v48 }
  0x11   :  { %113 = vmatpush.msra.mxu1 %v112_v32  ;;  %184 = vmatpush.msra.mxu2 %v127_v19  ;;  %v136_v41 = vand.u32 4294901760, %v135_v37  ;;  %v142_v43 = vand.u32 4294901760, %v141_v40  ;;  %v148_v44 = vand.u32 4294901760, %v147_v42  ;;  %v31_v52 = vand.u32 127, %v30_v51 }
  0x12   :  { %225 = vmatpush.msra.mxu3 %v473_v14  ;;  %76 = vmatpush.msra.mxu0 %v473_v14  ;;  %v154_v50 = vand.u32 4294901760, %v153_v49 }
  0x13   :  { %119 = vmatpush.msra.mxu1 %v118_v35  ;;  %187 = vmatpush.msra.mxu2 %v133_v21 }
  0x14   :  { %227 = vmatpush.msra.mxu3 %v476_v15  ;;  %78 = vmatpush.msra.mxu0 %v476_v15 }
  0x15   :  { %125 = vmatpush.msra.mxu1 %v124_v36  ;;  %190 = vmatpush.msra.mxu2 %v139_v22 }
  0x16   :  { %229 = vmatpush.msra.mxu3 %v478_v16  ;;  %80 = vmatpush.msra.mxu0 %v478_v16 }
  0x17   :  { %131 = vmatpush.msra.mxu1 %v130_v39  ;;  %193 = vmatpush.msra.mxu2 %v145_v29 }
  0x18   :  { %231 = vmatpush.msra.mxu3 %v81_v46  ;;  %82 = vmatpush.msra.mxu0 %v81_v46 }
  0x19   :  { %137 = vmatpush.msra.mxu1 %v136_v41  ;;  %196 = vmatpush.msra.mxu2 %v151_v47 }
  0x1a   :  { %366 = vmatpush.msrb.mxu3 %v463_v3  ;;  %256 = vmatpush.msrb.mxu0 %v110_v20 }
  0x1b   :  { %143 = vmatpush.msra.mxu1 %v142_v43  ;;  %358 = vmatpush.msrb.mxu2 %v110_v20 }
  0x1c   :  { %367 = vmatpush.msrb.mxu3 %v465_v7  ;;  %260 = vmatpush.msrb.mxu0 %v116_v24 }
  0x1d   :  { %149 = vmatpush.msra.mxu1 %v148_v44  ;;  %359 = vmatpush.msrb.mxu2 %v116_v24 }
  0x1e   :  { %368 = vmatpush.msrb.mxu3 %v467_v8  ;;  %264 = vmatpush.msrb.mxu0 %v122_v25 }
  0x1f   :  { %360 = vmatpush.msrb.mxu2 %v122_v25  ;;  %155 = vmatpush.msra.mxu1 %v154_v50 }
  0x20   :  { %369 = vmatpush.msrb.mxu3 %v469_v9  ;;  %268 = vmatpush.msrb.mxu0 %v489_v26 }
  0x21   :  { %303 = vmatpush.msrb.mxu1 %v463_v3  ;;  %361 = vmatpush.msrb.mxu2 %v489_v26 }
  0x22   :  { %370 = vmatpush.msrb.mxu3 %v473_v14  ;;  %272 = vmatpush.msrb.mxu0 %v492_v28 }
  0x23   :  { %305 = vmatpush.msrb.mxu1 %v465_v7  ;;  %362 = vmatpush.msrb.mxu2 %v492_v28 }
  0x24   :  { %371 = vmatpush.msrb.mxu3 %v476_v15  ;;  %276 = vmatpush.msrb.mxu0 %v140_v34 }
  0x25   :  { %307 = vmatpush.msrb.mxu1 %v467_v8  ;;  %363 = vmatpush.msrb.mxu2 %v140_v34 }
  0x26   :  { %372 = vmatpush.msrb.mxu3 %v478_v16  ;;  %280 = vmatpush.msrb.mxu0 %v146_v38 }
  0x27   :  { %309 = vmatpush.msrb.mxu1 %v469_v9  ;;  %364 = vmatpush.msrb.mxu2 %v146_v38 }
  0x28   :  { %373 = vmatpush.msrb.mxu3 %v81_v46  ;;  %284 = vmatpush.msrb.mxu0 %v152_v48 }
  0x29   :  { %311 = vmatpush.msrb.mxu1 %v473_v14  ;;  %365 = vmatpush.msrb.mxu2 %v152_v48 }
  0x2b   :  { %313 = vmatpush.msrb.mxu1 %v476_v15 }
  0x2d   :  { %315 = vmatpush.msrb.mxu1 %v478_v16 }
  0x2f   :  { %317 = vmatpush.msrb.mxu1 %v81_v46 }
  0x7a   :  { %v34_v53 = vpop.permute.xlu0 %33 }
  0x7b   :  { %vm38_vm1 = vcmp.eq.s32.totalorder %v34_v53, %v31_v52 }
  0x7c   :  { %v350_v55 = vsel %vm38_vm1, 1.0, %v437_v54 }
  0x7d   :  { %352 = vmatmul.msk.f32.vlgmr.msra.gmra.mxu1 %vm52_vm0, %v350_v55  ;;  %v54_v56 = vsel %vm52_vm0, %v350_v55, 0 }
  0x7e   :  { %v84_v57 = vsub.f32 %v54_v56, %v54_v56 }
  0x80   :  { %199 = vmatmul.f32.vlgmr.msra.gmra.mxu2 %v84_v57  ;;  %v85_v58 = vand.u32 4294901760, %v84_v57 }
  0x82   :  { %235 = vmatmul.f32.vlgmr.msra.gmra.mxu3 %v85_v58  ;;  %v37_v59 = vpop.permute.xlu0 %36  ;;  %v86_v60 = vsub.f32 %v84_v57, %v85_v58 }
  0x83   :  { %vm39_vm2 = vcmp.eq.s32.totalorder %v37_v59, %v31_v52 }
  0x84   :  { %v351_v61 = vsel %vm39_vm2, 1.0, %v437_v54  ;;  %v87_v62 = vand.u32 4294901760, %v86_v60 }
  0x85   :  { %353 = vmatmul.msk.f32.gmra.mxu1 %vm52_vm0, %v351_v61  ;;  %v57_v63 = vsel %vm52_vm0, %v351_v61, 0 }
  0x86   :  { %88 = vmatmul.f32.vlgmr.msra.gmra.mxu0 %v87_v62  ;;  %v92_v0 = vsub.f32 %v57_v63, %v57_v63 }
  0x88   :  { %204 = vmatmul.f32.gmra.mxu2 %v92_v0  ;;  %v93_v1 = vand.u32 4294901760, %v92_v0 }
  0x8a   :  { %241 = vmatmul.f32.gmra.mxu3 %v93_v1  ;;  %v94_v2 = vsub.f32 %v92_v0, %v93_v1 }
  0x8c   :  { %v95_v3 = vand.u32 4294901760, %v94_v2 }
  0x8d   :  { %356 = vmatmul.msk.f32.vlgmr.msrb.gmra.mxu1 %vm52_vm0, %v350_v55 }
  0x8e   :  { %96 = vmatmul.f32.gmra.mxu0 %v95_v3 }
  0x90   :  { %355 = vmatmul.msk.f32.vlgmr.msrb.gmra.mxu2 %vm52_vm0, %v351_v61 }
  0x92   :  { %357 = vmatmul.msk.f32.vlgmr.msrb.gmra.mxu3 %vm52_vm0, %v351_v61 }
  0x96   :  { %354 = vmatmul.msk.f32.vlgmr.msrb.gmra.mxu0 %vm52_vm0, %v350_v55 }
  0xfa   :  { %v158_v4 = vpop.f32.mrf.mxu1 }
 0x102   :  { %v162_v8 = vpop.f32.mrf.mxu1 }
 0x103   :  { %v89_v5 = vpop.f32.mrf.mxu0  ;;  %v200_v6 = vpop.f32.mrf.mxu2 }
 0x104   :  { %v159_v9 = vadd.f32 %v158_v4, %v89_v5 }
 0x105   :  { %v236_v7 = vpop.f32.mrf.mxu3 }
 0x106   :  { %v201_v14 = vadd.f32 %v200_v6, %v159_v9 }
 0x108   :  { %v237_v16 = vadd.f32 %v236_v7, %v201_v14 }
 0x10a   :  { %v320_v22 = vpop.f32.mrf.mxu1 }
 0x10b   :  { %v97_v10 = vpop.f32.mrf.mxu0  ;;  %v205_v11 = vpop.f32.mrf.mxu2 }
 0x10c   :  { %v163_v12 = vadd.f32 %v162_v8, %v97_v10 }
 0x10d   :  { %v242_v13 = vpop.f32.mrf.mxu3 }
 0x10e   :  { %v206_v15 = vadd.f32 %v205_v11, %v163_v12 }
 0x110   :  { %v243_v17 = vadd.f32 %v242_v13, %v206_v15 }
 0x113   :  { %v287_v18 = vpop.f32.mrf.mxu0  ;;  %v291_v19 = vpop.f32.mrf.mxu2 }
 0x114   :  { %v288_v20 = vadd.f32 %v287_v18, %v237_v16  ;;  %v292_v21 = vadd.f32 %v291_v19, %v243_v17 }
 0x115   :  { %v324_v23 = vpop.f32.mrf.mxu3 }
 0x116   :  { %v321_v24 = vadd.f32 %v320_v22, %v288_v20  ;;  %v325_v25 = vadd.f32 %v324_v23, %v292_v21 }
 0x118   :  { %v327_v26 = vmul.f32 11.313708, %v321_v24  ;;  %v328_v27 = vmul.f32 11.313708, %v325_v25 }
 0x11a   :  { %329 = vst [vmem:[#allocation5] sm:$0xff] %v327_v26 }
 0x11b   :  { %330 = vst [vmem:[#allocation5 + $0x8] sm:$0xff] %v328_v27 }
 0x11c   :  { %343 = dma.vmem_to_hbm [thread:$0]  %s336_s19, 256, %s338_s22, [#allocation4], %s434_s14, %s434_s14, %s435_s15  }
 0x11d   :  { %431 = dma.done.wait [#allocation4], 256  }
 0x11e   :  { %432 = vsyncadd [#allocation4], 4294967040 }
 0x11f   :  { %348 = vsyncpa [#allocation3], 1 }
 0x120   :  { %349 = vsyncpa [#allocation4], 1 }

</bundles_post_ra>
